<compile_context>
chip_gen: v5e
topology: v5e:2x2
jax: 0.10.0
libtpu: 0.0.40
codegen_flags: <defaults>
</compile_context>

<pallas_src>
import functools

import jax
import jax.numpy as jnp
from jax import lax
from jax.experimental import pallas as pl
from jax.experimental.pallas import tpu as pltpu


def _round_up(x, m):
    return (x + m - 1) // m * m


def _convgru_kernel(Hp, gate_dtype, w_ref, rhs_ref, out_ref):
    # w_ref:   (4*Hp, CKp)  compute dtype - fused block weights + bias column
    #          rows [0:Hp)=z, [Hp:2Hp)=r, [2Hp:3Hp)=ih_n, [3Hp:4Hp)=hh_n
    # rhs_ref: (CKp, tn)    compute dtype - [h taps (center tap first); x taps; 1]
    # out_ref: (Hp, tn)
    pre = jnp.dot(w_ref[...], rhs_ref[...],
                  preferred_element_type=jnp.float32)
    g = pre.astype(gate_dtype)                      # no-op when gate_dtype==f32
    z = jax.nn.sigmoid(g[0:Hp])
    r = jax.nn.sigmoid(g[Hp:2 * Hp])
    n = jnp.tanh(g[2 * Hp:3 * Hp] + r * g[3 * Hp:4 * Hp])
    # hx is the center-tap rows of the hidden-tap block (rows [0:Hp] of the RHS).
    h = rhs_ref[0:Hp, :].astype(jnp.float32)
    z32 = z.astype(jnp.float32)
    n32 = n.astype(jnp.float32)
    out_ref[...] = (n32 + z32 * (h - n32)).astype(out_ref.dtype)


def convgru1d_cell(x, w_ih, w_hh, b_ih, b_hh, hx=None, *, stride=1, padding=0,
                   compute_dtype=jnp.bfloat16, gate_dtype=jnp.float32,
                   tile_n=2048):
    """ConvGRU1D cell forward (matches the PyTorch module's forward).

    x:     (B, Cin, Lin)
    w_ih:  (3H, Cin, K)
    w_hh:  (3H, Cin, RK)   (module requires Cin == H for the hidden conv)
    b_ih:  (3H,)
    b_hh:  (3H,)
    hx:    (B, H, L_out) or None (-> zeros)
    returns: (B, H, L_out)

    gate_dtype: set to jnp.bfloat16 on v6e/v7x to use the bf16 EUP path for the
    sigmoid/tanh gating; keep f32 on v5e (no bf16 VPU/EUP there).
    """
    B, Cin, Lin = x.shape
    H3, Cin_w, K = w_ih.shape
    H = H3 // 3
    RK = w_hh.shape[2]
    if RK % 2 != 1:
        raise ValueError("recurrent_kernel_size must be odd (the module assumes "
                         "'same' padding RK//2 for the hidden-to-hidden conv).")
    if Cin_w != Cin:
        raise ValueError("w_ih in-channels must match the input channels.")
    if w_hh.shape[1] != H:
        raise ValueError("ConvGRU1DCell requires input_channels == hidden_channels "
                         "for the hidden-to-hidden convolution (as implied by the "
                         "PyTorch module's parameter shapes).")
    pad_hh = RK // 2
    L_out = (Lin - K + 2 * padding) // stride + 1
    if hx is None:
        hx = jnp.zeros((B, H, L_out), x.dtype)

    f32 = jnp.float32
    Hp = _round_up(H, 8)                      # sublane-aligned gate/output rows

    # ---- im2col RHS (B, CK, L_out): [h taps (center first) ; x taps ; ones] ----
    # Built with reshapes only (no batch-to-lane transpose pass).
    # TODO(synk): for stride==1 the taps could be formed in-kernel via pltpu.roll
    # on padded x/h slabs to avoid the (K+RK)x im2col HBM inflation entirely.
    hx_p = jnp.pad(hx.astype(f32), ((0, 0), (0, Hp - H), (0, 0)))
    h_pad = jnp.pad(hx_p, ((0, 0), (0, 0), (pad_hh, pad_hh)))
    x_pad = jnp.pad(x.astype(f32), ((0, 0), (0, 0), (padding, padding)))

    tap_order = [pad_hh] + [k for k in range(RK) if k != pad_hh]
    h_taps = jnp.stack([h_pad[:, :, k:k + L_out] for k in tap_order], axis=1)
    h_taps = h_taps.reshape(B, RK * Hp, L_out)        # rows [0:Hp] == hx (padded)

    span = stride * (L_out - 1) + 1
    x_taps = jnp.stack([x_pad[:, :, k:k + span:stride] for k in range(K)], axis=2)
    x_taps = x_taps.reshape(B, Cin * K, L_out)        # row = c*K + k

    ones = jnp.ones((B, 1, L_out), f32)               # bias row
    rhs = jnp.concatenate([h_taps, x_taps, ones], axis=1)
    CK = RK * Hp + Cin * K + 1
    CKp = _round_up(CK, 8)
    if CKp != CK:
        rhs = jnp.pad(rhs, ((0, 0), (0, CKp - CK), (0, 0)))

    # ---- fused block weight (4Hp, CKp); columns follow the RHS row layout ----
    wi = w_ih.reshape(H3, Cin * K).astype(f32)
    wh = jnp.pad(w_hh.astype(f32), ((0, 0), (0, Hp - H), (0, 0)))   # (3H, Hp, RK)
    wh = wh.transpose(0, 2, 1)[:, jnp.array(tap_order), :].reshape(H3, RK * Hp)

    zero_h = jnp.zeros((H, RK * Hp), f32)
    zero_x = jnp.zeros((H, Cin * K), f32)

    def gate_rows(h_part, x_part, bias):
        blk = jnp.concatenate([h_part, x_part, bias[:, None]], axis=1)  # (H, CK)
        return jnp.pad(blk, ((0, Hp - H), (0, CKp - CK)))

    w_fused = jnp.concatenate([
        gate_rows(wh[0:H], wi[0:H], b_ih[0:H] + b_hh[0:H]),                  # z
        gate_rows(wh[H:2 * H], wi[H:2 * H], b_ih[H:2 * H] + b_hh[H:2 * H]),  # r
        gate_rows(zero_h, wi[2 * H:], b_ih[2 * H:]),                         # ih_n
        gate_rows(wh[2 * H:], zero_x, b_hh[2 * H:]),                         # hh_n
    ], axis=0)                                                               # (4Hp, CKp)

    # ---- lane tiling: grid = (B, L tiles); both axes parallel (megacore) ----
    Lp128 = _round_up(L_out, 128)
    tn_cap = _round_up(max(int(tile_n), 128), 128)
    nt = -(-Lp128 // min(tn_cap, Lp128))              # number of lane tiles
    if B == 1 and nt == 1 and Lp128 > 128:
        nt = 2                                        # keep >=2 steps for v7x's 2 TCs
    tn = _round_up(-(-Lp128 // nt), 128)
    Lp = nt * tn
    if Lp != L_out:
        rhs = jnp.pad(rhs, ((0, 0), (0, 0), (0, Lp - L_out)))
    grid = (B, nt)

    out = pl.pallas_call(
        functools.partial(_convgru_kernel, Hp, gate_dtype),
        out_shape=jax.ShapeDtypeStruct((B, Hp, Lp), x.dtype),
        grid_spec=pltpu.PrefetchScalarGridSpec(
            num_scalar_prefetch=0,
            grid=grid,
            in_specs=[
                pl.BlockSpec((4 * Hp, CKp), lambda b, n: (0, 0)),        # fused W+bias
                pl.BlockSpec((None, CKp, tn), lambda b, n: (b, 0, n)),   # RHS tile
            ],
            out_specs=pl.BlockSpec((None, Hp, tn), lambda b, n: (b, 0, n)),
        ),
        compiler_params=pltpu.CompilerParams(
            dimension_semantics=("parallel", "parallel")),
    )(w_fused.astype(compute_dtype), rhs.astype(compute_dtype))

    return out[:, :H, :L_out]


def _reference(x, w_ih, w_hh, b_ih, b_hh, hx, *, stride, padding, pad_hh):
    """Pure-JAX reference (mirrors the PyTorch forward), f32."""
    ih = lax.conv_general_dilated(
        x, w_ih, window_strides=(stride,), padding=[(padding, padding)],
        dimension_numbers=("NCH", "OIH", "NCH")) + b_ih[None, :, None]
    hh = lax.conv_general_dilated(
        hx, w_hh, window_strides=(1,), padding=[(pad_hh, pad_hh)],
        dimension_numbers=("NCH", "OIH", "NCH")) + b_hh[None, :, None]
    H = hx.shape[1]
    z = jax.nn.sigmoid(ih[:, 0:H] + hh[:, 0:H])
    r = jax.nn.sigmoid(ih[:, H:2 * H] + hh[:, H:2 * H])
    n = jnp.tanh(ih[:, 2 * H:] + r * hh[:, 2 * H:])
    return (1.0 - z) * n + z * hx


if __name__ == "__main__":
    key = jax.random.PRNGKey(0)

    # ---------- config 1: B=2, Cin=H=8, Lin=16, K=3, stride=1, padding=1 ----------
    B, Cin, Lin = 2, 8, 16
    H = 8
    kernel_size, stride, padding = 3, 1, 1
    rec_kernel_size = 3
    pad_hh = rec_kernel_size // 2
    L_out = (Lin - kernel_size + 2 * padding) // stride + 1

    kx, kh, kwi, kwh, kbi, kbh = jax.random.split(key, 6)
    w_ih = 0.1 * jax.random.normal(kwi, (3 * H, Cin, kernel_size), jnp.float32)
    w_hh = 0.1 * jax.random.normal(kwh, (3 * H, Cin, rec_kernel_size), jnp.float32)
    b_ih = 0.01 * jax.random.normal(kbi, (3 * H,), jnp.float32)
    b_hh = 0.01 * jax.random.normal(kbh, (3 * H,), jnp.float32)
    x = jax.random.normal(kx, (B, Cin, Lin), jnp.float32)
    hx = jax.random.normal(kh, (B, H, L_out), jnp.float32)

    ref = _reference(x, w_ih, w_hh, b_ih, b_hh, hx,
                     stride=stride, padding=padding, pad_hh=pad_hh)

    # Exact path: f32 MXU operands -> tight tolerance vs. the f32 reference.
    out_f32 = convgru1d_cell(x, w_ih, w_hh, b_ih, b_hh, hx,
                             stride=stride, padding=padding,
                             compute_dtype=jnp.float32)
    out_f32 = jax.block_until_ready(out_f32)
    assert out_f32.shape == (B, H, L_out), out_f32.shape
    assert jnp.allclose(out_f32, ref, atol=1e-5, rtol=1e-5), (
        float(jnp.max(jnp.abs(out_f32 - ref))))

    # Default fast path: bf16 MXU operands, f32 accumulation + f32 gating/blend.
    out_bf16 = convgru1d_cell(x, w_ih, w_hh, b_ih, b_hh, hx,
                              stride=stride, padding=padding)
    out_bf16 = jax.block_until_ready(out_bf16)
    assert out_bf16.shape == (B, H, L_out), out_bf16.shape
    assert jnp.allclose(out_bf16, ref, atol=5e-2, rtol=5e-2), (
        float(jnp.max(jnp.abs(out_bf16 - ref))))

    # ---------- config 2: H not a multiple of 8, stride=2, padding=0, hx=None ----------
    B2, Cin2, Lin2 = 2, 4, 17
    H2, K2, stride2, padding2, RK2 = 4, 3, 2, 0, 3
    pad_hh2 = RK2 // 2
    L_out2 = (Lin2 - K2 + 2 * padding2) // stride2 + 1

    k2 = jax.random.split(key, 12)
    w_ih2 = 0.1 * jax.random.normal(k2[6], (3 * H2, Cin2, K2), jnp.float32)
    w_hh2 = 0.1 * jax.random.normal(k2[7], (3 * H2, Cin2, RK2), jnp.float32)
    b_ih2 = 0.01 * jax.random.normal(k2[8], (3 * H2,), jnp.float32)
    b_hh2 = 0.01 * jax.random.normal(k2[9], (3 * H2,), jnp.float32)
    x2 = jax.random.normal(k2[10], (B2, Cin2, Lin2), jnp.float32)
    hx2_zero = jnp.zeros((B2, H2, L_out2), jnp.float32)

    ref2 = _reference(x2, w_ih2, w_hh2, b_ih2, b_hh2, hx2_zero,
                      stride=stride2, padding=padding2, pad_hh=pad_hh2)

    out2_f32 = convgru1d_cell(x2, w_ih2, w_hh2, b_ih2, b_hh2, None,
                              stride=stride2, padding=padding2,
                              compute_dtype=jnp.float32)
    out2_f32 = jax.block_until_ready(out2_f32)
    assert out2_f32.shape == (B2, H2, L_out2), out2_f32.shape
    assert jnp.allclose(out2_f32, ref2, atol=1e-5, rtol=1e-5), (
        float(jnp.max(jnp.abs(out2_f32 - ref2))))

    out2_bf16 = convgru1d_cell(x2, w_ih2, w_hh2, b_ih2, b_hh2, None,
                               stride=stride2, padding=padding2)
    out2_bf16 = jax.block_until_ready(out2_bf16)
    assert out2_bf16.shape == (B2, H2, L_out2), out2_bf16.shape
    assert jnp.allclose(out2_bf16, ref2, atol=5e-2, rtol=5e-2), (
        float(jnp.max(jnp.abs(out2_bf16 - ref2))))

    print("KERNEL_OK")
</pallas_src>

<mosaic_0001>
module attributes {stable_mosaic.version = 11 : i64} {
  func.func @_convgru_kernel(%arg0: i32, %arg1: i32, %arg2: memref<32x56xf32, #tpu.memory_space<vmem>>, %arg3: memref<1x56x128xf32, #tpu.memory_space<vmem>>, %arg4: memref<1x8x128xf32, #tpu.memory_space<vmem>>) attributes {dimension_semantics = [#tpu.dimension_semantics<parallel>, #tpu.dimension_semantics<parallel>], iteration_bounds = array<i64: 2, 1>, scalar_prefetch = 0 : i64, scratch_operands = 0 : i64, tpu.core_type = #tpu.core_type<tc>, window_params = [{pipeline_mode = #tpu.pipeline_mode<synchronous>, transform_indices = @transform_0, window_bounds = array<i64: 32, 56>}, {transform_indices = @transform_1, window_bounds = array<i64: 1, 56, 128>}, {transform_indices = @transform_2, window_bounds = array<i64: 1, 8, 128>}]} {
    %c0 = arith.constant 0 : index
    %c0_0 = arith.constant 0 : index
    %0 = vector.load %arg2[%c0, %c0_0] : memref<32x56xf32, #tpu.memory_space<vmem>>, vector<32x56xf32>
    %c0_1 = arith.constant 0 : index
    %c0_2 = arith.constant 0 : index
    %c0_3 = arith.constant 0 : index
    %1 = vector.load %arg3[%c0_1, %c0_2, %c0_3] : memref<1x56x128xf32, #tpu.memory_space<vmem>>, vector<1x56x128xf32>
    %2 = vector.shape_cast %1 : vector<1x56x128xf32> to vector<56x128xf32>
    %cst = arith.constant dense<0.000000e+00> : vector<32x128xf32>
    %3 = tpu.matmul %0, %2, %cst {dimension_numbers = #tpu.dot_dimension_numbers<[1], [0], [0], [1], [0, 0, 1, 1], [], []>} : vector<32x56xf32>, vector<56x128xf32>, vector<32x128xf32> -> vector<32x128xf32>
    %4 = vector.extract_strided_slice %3 {offsets = [0, 0], sizes = [8, 128], strides = [1, 1]} : vector<32x128xf32> to vector<8x128xf32>
    %5 = arith.negf %4 : vector<8x128xf32>
    %6 = math.exp %5 : vector<8x128xf32>
    %cst_4 = arith.constant 1.000000e+00 : f32
    %7 = vector.broadcast %cst_4 : f32 to vector<8x128xf32>
    %8 = arith.addf %7, %6 : vector<8x128xf32>
    %9 = arith.divf %7, %8 : vector<8x128xf32>
    %10 = vector.extract_strided_slice %3 {offsets = [8, 0], sizes = [8, 128], strides = [1, 1]} : vector<32x128xf32> to vector<8x128xf32>
    %11 = arith.negf %10 : vector<8x128xf32>
    %12 = math.exp %11 : vector<8x128xf32>
    %cst_5 = arith.constant 1.000000e+00 : f32
    %13 = vector.broadcast %cst_5 : f32 to vector<8x128xf32>
    %14 = arith.addf %13, %12 : vector<8x128xf32>
    %15 = arith.divf %13, %14 : vector<8x128xf32>
    %16 = vector.extract_strided_slice %3 {offsets = [16, 0], sizes = [8, 128], strides = [1, 1]} : vector<32x128xf32> to vector<8x128xf32>
    %17 = vector.extract_strided_slice %3 {offsets = [24, 0], sizes = [8, 128], strides = [1, 1]} : vector<32x128xf32> to vector<8x128xf32>
    %18 = arith.mulf %15, %17 : vector<8x128xf32>
    %19 = arith.addf %16, %18 : vector<8x128xf32>
    %20 = math.tanh %19 : vector<8x128xf32>
    %c0_6 = arith.constant 0 : index
    %c0_7 = arith.constant 0 : index
    %c0_8 = arith.constant 0 : index
    %21 = vector.load %arg3[%c0_6, %c0_7, %c0_8] : memref<1x56x128xf32, #tpu.memory_space<vmem>>, vector<1x8x128xf32>
    %22 = vector.shape_cast %21 : vector<1x8x128xf32> to vector<8x128xf32>
    %23 = arith.subf %22, %20 : vector<8x128xf32>
    %24 = arith.mulf %9, %23 : vector<8x128xf32>
    %25 = arith.addf %20, %24 : vector<8x128xf32>
    %c0_9 = arith.constant 0 : index
    %c0_10 = arith.constant 0 : index
    %c0_11 = arith.constant 0 : index
    %26 = vector.load %arg4[%c0_9, %c0_10, %c0_11] : memref<1x8x128xf32, #tpu.memory_space<vmem>>, vector<1x8x128xf32>
    %27 = vector.shape_cast %26 : vector<1x8x128xf32> to vector<8x128xf32>
    %28 = vector.shape_cast %25 : vector<8x128xf32> to vector<1x8x128xf32>
    tpu.vector_store %arg4[%c0_9, %c0_10, %c0_11], %28 {strides = array<i32>} : memref<1x8x128xf32, #tpu.memory_space<vmem>>, vector<1x8x128xf32>,
    return
  }
  func.func @transform_0(%arg0: i32, %arg1: i32) -> (i32, i32) {
    %c0_i32 = arith.constant 0 : i32
    %c0_i32_0 = arith.constant 0 : i32
    %c0_i32_1 = arith.constant 0 : i32
    return %c0_i32, %c0_i32_0 : i32, i32
  }
  func.func @transform_1(%arg0: i32, %arg1: i32) -> (i32, i32, i32) {
    %c0_i32 = arith.constant 0 : i32
    %c0_i32_0 = arith.constant 0 : i32
    return %arg0, %c0_i32, %arg1 : i32, i32, i32
  }
  func.func @transform_2(%arg0: i32, %arg1: i32) -> (i32, i32, i32) {
    %c0_i32 = arith.constant 0 : i32
    %c0_i32_0 = arith.constant 0 : i32
    return %arg0, %c0_i32, %arg1 : i32, i32, i32
  }
}

</mosaic_0001>

<bundles_post_ra>
// kernel: tpu_custom_call.1
= control target key start
LH: loop header
LB: loop body
LE: loop exit
PB: predicated region body
PF: predicated region fallthrough
CT: control target
= control target key end

     0   :  { %7 = vsyncpa [#allocation3], 0  ;;  %s858_s0 = inlined_call_operand.hbm [shape: f32[32,56], index: 0, kind: input, shape index: {}]   ;;  %s859_s1 = inlined_call_operand.hbm [shape: f32[2,56,128], index: 1, kind: input, shape index: {}]   ;;  %s860_s2 = inlined_call_operand.hbm [shape: f32[2,8,128], index: 2, kind: output, shape index: {}]  }
   0x1   :  { %8 = vsyncpa [#allocation6], 0 }
   0x2   :  { %10 = vsyncpa [#allocation6 + $0x1], 0 }
   0x3   :  { %11 = vsyncpa [#allocation4], 0 }
   0x4   :  { %13 = vsyncpa [#allocation4 + $0x1], 0  ;;  %s701_s9 = smov 0   ;;  %s703_s10 = smov 0  }
   0x5   :  { %s705_s11 = smov 0   ;;  %s707_s12 = smov 0  }
   0x6   :  { %s709_s13 = smov 0   ;;  %s711_s14 = smov 0  }
   0x7 LB: > { %s407_s15 = sadd.s32 4294967295, %s681_s14   ;;  %s408_s16 = sadd.s32 4294967294, %s681_s14   ;;  %s681_s14 = sphi %s711_s14, %s19_s14   ;;  %s677_s13 = sphi %s709_s13, %s871_s13   ;;  %s673_s12 = sphi %s707_s12, %s870_s12   ;;  %s669_s11 = sphi %s705_s11, %s869_s11   ;;  %s665_s10 = sphi %s703_s10, %s868_s10   ;;  %s661_s9 = sphi %s701_s9, %s867_s9  }
   0x8   : > { %p74_p0 = scmp.ne.s32.totalorder %s665_s10, %s661_s9  ;;  %p735_p1 = scmp.eq.s32.totalorder %s407_s15, 0 }
   0x9   : > { %p739_p2 = scmp.eq.s32.totalorder %s407_s15, 1  ;;  %p106_p3 = scmp.eq.s32.totalorder %s408_s16, 1 }
   0xa   : > { %p745_p4 = por %p735_p1, %p74_p0  ;;  %p409_p5 = scmp.ge.s32.totalorder %s681_s14, 1 }
   0xb   : > { %p750_p6 = por %p106_p3, %p74_p0  ;;  %p113_p7 = scmp.lt.s32.totalorder %s681_s14, 3 }
   0xc   : > { %s124_s23 = sshll.u32 %s858_s0, 4  ;;  %s683_s25 = smov [#allocation2]   ;;  %s125_s23 = int_to_ptr.hbm [resolvable:$true] %s124_s23 }
   0xd   : > { %p758_p8 = pnand %p409_p5, %p113_p7  ;;  %s126_s26 = sshll.u32 %s683_s25, 4  ;;  %s127_s26 = int_to_ptr.vmem [resolvable:$true] %s126_s26 }
   0xe   : > { %p411_p11 = scmp.ge.s32.totalorder %s681_s14, 2  ;;  %s684_s27 = smov 128  }
   0xf   : > { %p458_p9 = pneg %p758_p8  ;;  %s685_s28 = smov 8  }
  0x10   : > { %s31_s29 = sadd.s32 1, %s677_s13  ;;  %s61_s30 = sadd.s32 1, %s669_s11 }
  0x11   : > { %p459_p10 = pnand %p458_p9, %p735_p1  ;;  %p33_p12 = scmp.ge.s32.totalorder %s31_s29, 2 }
  0x12   : > { %p68_p13 = scmp.ne.s32.totalorder %s669_s11, %s665_s10  ;;  %p69_p0 = scmp.eq.s32.totalorder %s681_s14, 0 }
  0x13   : > { %461 = dma.hbm_to_vmem [thread:$0]  (!%p459_p10), %s125_s23, 512, %s127_s26, [#allocation3], %s684_s27, %s684_s27, %s685_s28  }
  0x14   : > { %s873_s29 = smov (%p33_p12, %s31_s29), 0  ;;  %p70_p3 = por %p69_p0, %p68_p13 }
  0x15   : > { %p779_p5 = por %p739_p2, %p68_p13  ;;  %s56_s4 = ssub.s32 %s677_s13, %s873_s29 }
  0x16   : > { %p471_p7 = scmp.lt.s32.totalorder %s681_s14, 2  ;;  %p59_p9 = scmp.eq.s32.totalorder %s56_s4, 0 }
  0x17   : > { %s140_s5 = sand.u32 1, %s669_s11   ;;  %s448_s8 = smul.u32 56, %s677_s13 }
  0x18   : > { %s447_s6 = smul.u32 56, %s140_s5  ;;  %p463_p10 = pnand %p471_p7, %p70_p3 }
  0x19   : > { %s788_s7 = scalar_select %p59_p9, %s669_s11, %s61_s30  }
  0x1a   : > { %s144_s15 = scalar_lea.vmem [#allocation5], %s447_s6  ;;  %s150_s23 = scalar_lea.hbm %s859_s1, %s448_s8 }
  0x1b   : > { %s153_s16 = sshll.u32 %s144_s15, 4  ;;  %s151_s18 = sshll.u32 %s150_s23, 4  ;;  %s154_s16 = int_to_ptr.vmem [resolvable:$true] %s153_s16  ;;  %s152_s18 = int_to_ptr.hbm [resolvable:$true] %s151_s18 }
  0x1c   : > { %s141_s25 = scalar_lea.sflag [#allocation6], %s140_s5  ;;  %165 = sbr.rel (%p758_p8) target bundleno = 228 (0xe4), region = 28 }
  0x1d   : > { %465 = dma.hbm_to_vmem [thread:$0]  (!%p463_p10), %s152_s18, 896, %s154_s16, %s141_s25, %s684_s27, %s684_s27, %s685_s28  }
  0x21   : > { %648 = dma.done.wait (%p735_p1), [#allocation3], 512  }
  0x22   : > { %650 = vsyncadd (%p735_p1), [#allocation3], 4294966784  ;;  %s804_s26 = sand.u32 1, %s665_s10  }
  0x23   : > { %s449_s30 = smul.u32 56, %s804_s26  ;;  %s173_s4 = scalar_lea.sflag [#allocation6], %s804_s26 }
  0x25   : > { %s176_s5 = scalar_lea.vmem [#allocation5], %s449_s30 }
  0x26   : > { %652 = dma.done.wait (%p745_p4), %s173_s4, 896  }
  0x27   : > { %654 = vsyncadd (%p745_p4), %s173_s4, 4294966400  ;;  %v208_v0 = vld [vmem:[%s176_s5 + $0x30] sm:$0xff]  ;;  %v207_v1 = vld [vmem:[%s176_s5 + $0x28] sm:$0xff]  ;;  %vm209_vm0 = vcmask 457728   ;;  %s415_s17 = sshll.u32 %s804_s26, 3  ;;  %s423_s19 = sshll.u32 %s673_s12, 3 }
  0x28   : > { %231 = vmatpush.msra.mxu0 %v208_v0  ;;  %426 = vmatpush.msra.mxu1 %v208_v0  ;;  %v206_v2 = vld [vmem:[%s176_s5 + $0x20] sm:$0xff]  ;;  %v205_v3 = vld [vmem:[%s176_s5 + $0x18] sm:$0xff]  ;;  %v204_v4 = vld [vmem:[%s176_s5 + $0x10] sm:$0xff]  ;;  %s309_s28 = scalar_lea.hbm %s860_s2, %s423_s19  ;;  %s197_s6 = scalar_lea.vmem [#allocation7], %s415_s17 }
  0x29   : > { %428 = vmatpush.msra.mxu3 %v208_v0  ;;  %427 = vmatpush.msra.mxu2 %v208_v0  ;;  %v203_v5 = vld [vmem:[%s176_s5 + $0x8] sm:$0xff]  ;;  %v812_v6 = vld [vmem:[%s176_s5] sm:$0xff]  ;;  %v200_v10 = vld [vmem:[#allocation2 + $0x10] sm:$0xff]  ;;  %s311_s8 = sshll.u32 %s197_s6, 4  ;;  %s313_s15 = sshll.u32 %s309_s28, 4  ;;  %s312_s8 = int_to_ptr.vmem [resolvable:$true] %s311_s8  ;;  %s314_s15 = int_to_ptr.hbm [resolvable:$true] %s313_s15 }
  0x2a   : > { %232 = vmatpush.msra.mxu0 %v207_v1  ;;  %429 = vmatpush.msra.mxu1 %v207_v1  ;;  %v198_v7 = vld [vmem:[#allocation2] sm:$0xff]  ;;  %v199_v8 = vld [vmem:[#allocation2 + $0x8] sm:$0xff]  ;;  %v201_v9 = vld [vmem:[#allocation2 + $0x18] sm:$0xff]  ;;  %s298_s12 = scalar_lea.sflag [#allocation4], %s804_s26  ;;  %s609_s16 = sshra.s32 %s314_s15, 4  ;;  %s610_s16 = int_to_ptr.hbm [resolvable:$true] %s609_s16 }
  0x2b   : > { %431 = vmatpush.msra.mxu3 %v207_v1  ;;  %430 = vmatpush.msra.mxu2 %v207_v1  ;;  %s611_s21 = scalar_lea.hbm %s610_s16, 8  ;;  %s615_s18 = scalar_lea.hbm %s860_s2, 16 }
  0x2c   : > { %233 = vmatpush.msra.mxu0 %v206_v2  ;;  %432 = vmatpush.msra.mxu1 %v206_v2  ;;  %p612_p1 = scmp.ne.s32.totalorder %s610_s16, %s611_s21  ;;  %p616_p8 = scmp.lt.s32.totalorder %s610_s16, %s860_s2 }
  0x2d   : > { %434 = vmatpush.msra.mxu3 %v206_v2  ;;  %433 = vmatpush.msra.mxu2 %v206_v2  ;;  %p617_p12 = scmp.lt.s32.totalorder %s615_s18, %s611_s21 }
  0x2e   : > { %234 = vmatpush.msra.mxu0 %v205_v3  ;;  %435 = vmatpush.msra.mxu1 %v205_v3  ;;  %p613_p2 = pnand %p612_p1, %p779_p5 }
  0x2f   : > { %437 = vmatpush.msra.mxu3 %v205_v3  ;;  %436 = vmatpush.msra.mxu2 %v205_v3  ;;  %p618_p13 = por %p617_p12, %p616_p8 }
  0x30   : > { %235 = vmatpush.msra.mxu0 %v204_v4  ;;  %438 = vmatpush.msra.mxu1 %v204_v4  ;;  %p614_p4 = pneg %p613_p2 }
  0x31   : > { %440 = vmatpush.msra.mxu3 %v204_v4  ;;  %439 = vmatpush.msra.mxu2 %v204_v4 }
  0x32   : > { %236 = vmatpush.msra.mxu0 %v203_v5  ;;  %441 = vmatpush.msra.mxu1 %v203_v5  ;;  %p619_p0 = pnand %p618_p13, %p614_p4 }
  0x33   : > { %443 = vmatpush.msra.mxu3 %v203_v5  ;;  %442 = vmatpush.msra.mxu2 %v203_v5 }
  0x34   : > { %237 = vmatpush.msra.mxu0 %v812_v6  ;;  %444 = vmatpush.msra.mxu1 %v812_v6 }
  0x35   : > { %416 = vmatmul.msk.f32.vlgmr.msra.gmra.mxu0 %vm209_vm0, %v198_v7  ;;  %417 = vmatmul.msk.f32.vlgmr.msra.gmra.mxu1 %vm209_vm0, %v199_v8 }
  0x36   : > { %446 = vmatpush.msra.mxu3 %v812_v6  ;;  %445 = vmatpush.msra.mxu2 %v812_v6 }
  0x37   : > { %419 = vmatmul.msk.f32.vlgmr.msra.gmra.mxu3 %vm209_vm0, %v201_v9  ;;  %418 = vmatmul.msk.f32.vlgmr.msra.gmra.mxu2 %vm209_vm0, %v200_v10 }
  0xb2   : > { %v239_v11 = vpop.f32.mrf.mxu0  ;;  %v242_v12 = vpop.f32.mrf.mxu1 }
  0xb3   : > { %v420_v13 = vmul.f32 -1.442695, %v239_v11  ;;  %v421_v14 = vmul.f32 -1.442695, %v242_v12 }
  0xb5   : > { %525 = vpow2.f32 %v420_v13 }
  0xb6   : > { %527 = vpow2.f32 %v421_v14 }
  0xba   : > { %v248_v29 = vpop.f32.mrf.mxu3  ;;  %v245_v33 = vpop.f32.mrf.mxu2 }
  0xbb   : > { %v526_v15 = vpop.eup %525 }
  0xbc   : > { %v528_v16 = vpop.eup %527  ;;  %v254_v17 = vadd.f32 1.0, %v526_v15 }
  0xbd   : > { %v273_v18 = vadd.f32 1.0, %v528_v16 }
  0xbe   : > { %vm260_vm5 = vweird.f32 %v254_v17  ;;  %v266_v37 = vand.u32 2147483648, %v254_v17  ;;  %v264_v39 = vand.u32 2147483647, %v254_v17 }
  0xbf   : > { %529 = vrcp.f32 %v273_v18  ;;  %v285_v24 = vand.u32 2147483648, %v273_v18  ;;  %v283_v26 = vand.u32 2147483647, %v273_v18  ;;  %vm279_vm2 = vweird.f32 %v273_v18 }
  0xc0   : > { %531 = vrcp.f32 %v254_v17  ;;  %v267_v40 = vor.u32 1.1754944e-38, %v266_v37  ;;  %vm265_vm8 = vcmp.eq.f32.partialorder %v264_v39, 8.507059e+37 }
  0xc1   : > { %v286_v30 = vor.u32 1.1754944e-38, %v285_v24  ;;  %vm284_vm4 = vcmp.eq.f32.partialorder %v283_v26, 8.507059e+37 }
  0xc5   : > { %v530_v19 = vpop.eup %529 }
  0xc6   : > { %v532_v20 = vpop.eup %531  ;;  %v275_v21 = vmul.f32 %v530_v19, %v273_v18  ;;  %vm280_vm1 = vweird.f32 %v530_v19 }
  0xc7   : > { %v256_v23 = vmul.f32 %v532_v20, %v254_v17  ;;  %vm281_vm3 = vmor %vm279_vm2, %vm280_vm1  ;;  %vm261_vm6 = vweird.f32 %v532_v20 }
  0xc8   : > { %v276_v22 = vsub.f32 1.0, %v275_v21  ;;  %vm262_vm7 = vmor %vm260_vm5, %vm261_vm6 }
  0xc9   : > { %v257_v28 = vsub.f32 1.0, %v256_v23 }
  0xca   : > { %v277_v25 = vmul.f32 %v530_v19, %v276_v22 }
  0xcb   : > { %v258_v35 = vmul.f32 %v532_v20, %v257_v28 }
  0xcc   : > { %v278_v27 = vadd.f32 %v530_v19, %v277_v25 }
  0xcd   : > { %v259_v38 = vadd.f32 %v532_v20, %v258_v35 }
  0xce   : > { %v282_v31 = vsel %vm281_vm3, %v530_v19, %v278_v27 }
  0xcf   : > { %v287_v32 = vsel %vm284_vm4, %v286_v30, %v282_v31  ;;  %v263_v41 = vsel %vm262_vm7, %v532_v20, %v259_v38 }
  0xd0   : > { %v289_v34 = vmul.f32 %v287_v32, %v248_v29  ;;  %v268_v44 = vsel %vm265_vm8, %v267_v40, %v263_v41 }
  0xd2   : > { %v290_v36 = vadd.f32 %v289_v34, %v245_v33 }
  0xd4   : > { %533 = vtanh.f32 %v290_v36 }
  0xda   : > { %v534_v42 = vpop.eup %533 }
  0xdb   : > { %v293_v43 = vsub.f32 %v812_v6, %v534_v42 }
  0xdd   : > { %v294_v45 = vmul.f32 %v293_v43, %v268_v44 }
  0xdf   : > { %v295_v46 = vadd.f32 %v534_v42, %v294_v45 }
  0xe1   : > { %296 = vst [vmem:[%s197_s6] sm:$0xff] %v295_v46 }
  0xe2   : > { %622 = shalt.err (!%p619_p0)
}
  0xe3   : > { %456 = dma.vmem_to_hbm [thread:$0]  (%p779_p5), %s312_s8, 128, %s314_s15, %s298_s12  }
  0xe4 PF: > { %s325_s26 = sand.u32 1, %s661_s9   ;;  %p467_p3 = pnand %p411_p11, %p750_p6 }
  0xe5   : > { %s326_s4 = scalar_lea.sflag [#allocation4], %s325_s26 }
  0xe6   : > { %p468_p7 = pneg %p467_p3 }
  0xe8   : > { %656 = dma.done.wait (%p468_p7), %s326_s4, 128  }
  0xe9   : > { %658 = vsyncadd (%p468_p7), %s326_s4, 4294967168  ;;  %s19_s14 = sadd.s32 1, %s681_s14   ;;  %s867_s9 = smov %s665_s10 }
  0xea   : > { %p16_p9 = scmp.ge.s32.totalorder %s19_s14, 4   ;;  %s868_s10 = smov %s669_s11 }
  0xeb   : > { %s869_s11 = smov %s788_s7  ;;  %s870_s12 = smov %s677_s13 }
  0xec   : > { %s871_s13 = smov %s873_s29  ;;  %18 = sbr.rel (!%p16_p9) target bundleno = 7 (0x7), region = 78 }
  0xf1   :  { %332 = vsyncpa [#allocation3], 1 }
  0xf2   :  { %334 = vsyncpa [#allocation3 + $0x1], 1 }
  0xf3   :  { %335 = vsyncpa [#allocation6], 1 }
  0xf4   :  { %337 = vsyncpa [#allocation6 + $0x1], 1 }
  0xf5   :  { %338 = vsyncpa [#allocation4], 1 }
  0xf6   :  { %340 = vsyncpa [#allocation4 + $0x1], 1 }

</bundles_post_ra>
